<compile_context>
chip_gen: v7x
topology: tpu7x:2x2x1
jax: 0.10.0
libtpu: 0.0.40
codegen_flags: <defaults>
</compile_context>

<pallas_src>
import jax
import jax.numpy as jnp
from jax.experimental import pallas as pl
from jax.experimental.pallas import tpu as pltpu


def _chip_params():
    """Generation-aware tuning knobs (conservative defaults if unknown)."""
    kind = ""
    try:
        kind = jax.devices()[0].device_kind.lower()
    except Exception:
        pass
    if "7x" in kind or "v7" in kind:
        # v7x: 64 MiB physical VMEM / TC, ~3.2 TB/s HBM, 2 TensorCores per chip.
        return dict(step_budget=32 << 20, vmem_limit=48 << 20,
                    two_cores=True, bf16_native=True)
    if "v6" in kind:
        # v6e: 128 MiB VMEM, ~1.4 TB/s HBM, 1 TensorCore.
        return dict(step_budget=28 << 20, vmem_limit=64 << 20,
                    two_cores=False, bf16_native=True)
    # v5e (and unknown / older): 16 MiB default scoped VMEM -> stay well under.
    return dict(step_budget=10 << 20, vmem_limit=None,
                two_cores=False, bf16_native=False)


def _sublane_pack(itemsize):
    # Rows per native sublane tile: 8 for 4-byte, 16 for 2-byte, 32 for 1-byte.
    return max(8, 32 // max(1, itemsize))


def _drop_path_kernel(s_ref, x_ref, o_ref):
    # s_ref: (rows_tile, 1) per-row scale (0.0 or 1/keep_prob)
    # x_ref / o_ref: (rows_tile, cols) tile of the (reshaped) activations
    o_ref[...] = (x_ref[...] * s_ref[...]).astype(o_ref.dtype)  # lane broadcast


def _choose_cols(F, B, itemsize, pack, step_budget):
    """Largest multiple-of-128 divisor of F that still leaves >= pack total
    rows (so sublanes fill even for tiny batches) and fits the VMEM budget."""
    max_c = ((step_budget // (2 * pack) - 512) // (2 * itemsize)) // 128 * 128
    max_c = max(128, max_c)
    cands = [c for c in range(128, min(F, max_c) + 1, 128) if F % c == 0]
    if not cands:
        return 128
    good = [c for c in cands if B * (F // c) >= pack]
    return max(good) if good else min(cands)


def drop_path(x, drop_prob: float = 0.0, training: bool = False, key=None,
              donate_x: bool = False):
    """Pallas implementation of drop_path_f (forward only)."""
    if drop_prob == 0.0 or not training:
        return x
    if key is None:
        raise ValueError("key required when training with drop_prob > 0")

    keep_prob = 1.0 - drop_prob
    B = x.shape[0]
    F = 1
    for d in x.shape[1:]:
        F *= d
    itemsize = x.dtype.itemsize

    hw = _chip_params()
    step_budget = hw["step_budget"]
    pack = _sublane_pack(itemsize)

    # Per-sample mask & scale, computed once (hoisted out of the per-tile body).
    # Multiply natively in x.dtype for 16-bit floats on bf16-capable chips.
    mul_dtype = (x.dtype if (hw["bf16_native"]
                             and x.dtype in (jnp.bfloat16, jnp.float16))
                 else jnp.float32)
    u = jax.random.uniform(key, (B,), dtype=jnp.float32)
    scale = (jnp.floor(keep_prob + u) * (1.0 / keep_prob)).astype(mul_dtype)

    cost = pl.CostEstimate(
        flops=B * F,
        transcendentals=0,
        bytes_accessed=2 * B * F * itemsize + 4 * B,
    )

    def _cparams(sem):
        kw = dict(dimension_semantics=sem)
        if hw["vmem_limit"] is not None:
            kw["vmem_limit_bytes"] = int(hw["vmem_limit"])
        return pltpu.CompilerParams(**kw)

    io_alias = {1: 0} if donate_x else {}

    if F >= 128 and F % 128 == 0:
        # Sublane/lane-dense path: (B, F) -> (B*R, C), per-row scale column.
        C = _choose_cols(F, B, itemsize, pack, step_budget)
        R = F // C
        rows = B * R
        xr = x.reshape(rows, C)
        scale_rows = jnp.repeat(scale, R).reshape(rows, 1)

        # Per-row VMEM: in + out data rows plus the lane-padded scale column
        # (a (r,1) column pads to 128 lanes -> <=512 B/row), all double-buffered.
        bytes_per_row = 2 * (2 * C * itemsize + 512)
        rows_per_block = max(pack, (step_budget // bytes_per_row) // pack * pack)

        if rows_per_block >= rows:
            if hw["two_cores"] and rows >= 2 * pack:
                # Split as evenly as the sublane pack allows so both v7x
                # TensorCores drive HBM.
                half = (rows + 1) // 2
                tile_rows = ((half + pack - 1) // pack) * pack
            else:
                tile_rows = rows          # full dim -> single step, no overhead
        else:
            tile_rows = rows_per_block    # multiple of pack; ragged tail masked

        grid = (pl.cdiv(rows, tile_rows),)

        out = pl.pallas_call(
            _drop_path_kernel,
            out_shape=jax.ShapeDtypeStruct((rows, C), x.dtype),
            grid_spec=pltpu.PrefetchScalarGridSpec(
                num_scalar_prefetch=0,
                grid=grid,
                in_specs=[
                    pl.BlockSpec((tile_rows, 1), lambda i: (i, 0)),   # per-row scale
                    pl.BlockSpec((tile_rows, C), lambda i: (i, 0)),   # x tile
                ],
                out_specs=pl.BlockSpec((tile_rows, C), lambda i: (i, 0)),
            ),
            compiler_params=_cparams(("parallel",)),
            cost_estimate=cost,
            input_output_aliases=io_alias,
        )(scale_rows, xr)
        return out.reshape(x.shape)

    # Fallback: F not a multiple of 128 — 2-D grid over (batch rows, lanes).
    xf = x.reshape(B, F)
    scale2 = scale.reshape(B, 1)

    if F < 128:
        tf = F                                           # full lane dim
    else:
        tf_cap = ((step_budget // (2 * pack) - 512) // (2 * itemsize)) // 128 * 128
        tf_cap = max(128, tf_cap)
        tf = min((F // 128) * 128, tf_cap)               # multiple of 128; tail masked

    tb = step_budget // (2 * (2 * tf * itemsize + 512))
    tb = max(pack, tb // pack * pack)
    if tb >= B:
        tb = B                                           # full dim block

    grid = (pl.cdiv(B, tb), pl.cdiv(F, tf))

    out = pl.pallas_call(
        _drop_path_kernel,
        out_shape=jax.ShapeDtypeStruct((B, F), x.dtype),
        grid_spec=pltpu.PrefetchScalarGridSpec(
            num_scalar_prefetch=0,
            grid=grid,
            in_specs=[
                # constant lane-block index -> scale not re-fetched across lane tiles
                pl.BlockSpec((tb, 1), lambda i, j: (i, 0)),
                pl.BlockSpec((tb, tf), lambda i, j: (i, j)),
            ],
            out_specs=pl.BlockSpec((tb, tf), lambda i, j: (i, j)),
        ),
        compiler_params=_cparams(("parallel", "parallel")),
        cost_estimate=cost,
        input_output_aliases=io_alias,
    )(scale2, xf)
    return out.reshape(x.shape)


class DropPath:
    """Mirror of the PyTorch DropPath module (forward only)."""

    def __init__(self, drop_prob=None):
        self.drop_prob = drop_prob
        self.training = True

    def __call__(self, x, key=None):
        return drop_path(x, self.drop_prob or 0.0, self.training, key)


if __name__ == "__main__":
    key = jax.random.PRNGKey(0)
    kx, ku = jax.random.split(key)

    # small NCHW input consistent with the module's usage
    x = jax.random.normal(kx, (2, 4, 16, 16), dtype=jnp.float32)

    module = DropPath(drop_prob=0.25)
    module.training = True

    out = module(x, key=ku)
    out = jax.block_until_ready(out)

    # cross-check against a pure-JAX reference using the same randoms
    keep_prob = 1.0 - 0.25
    u = jax.random.uniform(ku, (2,), dtype=jnp.float32)
    mask = jnp.floor(keep_prob + u).reshape(2, 1, 1, 1)
    ref = (x / keep_prob) * mask
    assert jnp.allclose(out, ref, atol=1e-5, rtol=1e-5), "mismatch vs reference"

    # exercise the fallback (F % 128 != 0) path as well
    x2 = jax.random.normal(kx, (4, 3, 7, 9), dtype=jnp.float32)
    out2 = jax.block_until_ready(drop_path(x2, 0.25, True, key=ku))
    u2 = jax.random.uniform(ku, (4,), dtype=jnp.float32)
    ref2 = (x2 / keep_prob) * jnp.floor(keep_prob + u2).reshape(4, 1, 1, 1)
    assert jnp.allclose(out2, ref2, atol=1e-5, rtol=1e-5), "fallback mismatch"

    # eval mode / drop_prob=0 -> identity (no kernel launch, matches PyTorch)
    module.training = False
    out_eval = jax.block_until_ready(module(x))
    assert jnp.array_equal(out_eval, x)

    print("KERNEL_OK")
</pallas_src>

<mosaic_0001>
module attributes {stable_mosaic.version = 11 : i64} {
  func.func @_drop_path_kernel(%arg0: i32, %arg1: memref<8x1xf32, #tpu.memory_space<vmem>>, %arg2: memref<8x256xf32, #tpu.memory_space<vmem>>, %arg3: memref<8x256xf32, #tpu.memory_space<vmem>>) attributes {dimension_semantics = [#tpu.dimension_semantics<parallel>], iteration_bounds = array<i64: 1>, scalar_prefetch = 0 : i64, scratch_operands = 0 : i64, tpu.core_type = #tpu.core_type<tc>, window_params = [{transform_indices = @transform_0, window_bounds = array<i64: 8, 1>}, {transform_indices = @transform_1, window_bounds = array<i64: 8, 256>}, {transform_indices = @transform_2, window_bounds = array<i64: 8, 256>}]} {
    %c0 = arith.constant 0 : index
    %c0_0 = arith.constant 0 : index
    %0 = vector.load %arg2[%c0, %c0_0] : memref<8x256xf32, #tpu.memory_space<vmem>>, vector<8x256xf32>
    %c0_1 = arith.constant 0 : index
    %c0_2 = arith.constant 0 : index
    %1 = vector.load %arg1[%c0_1, %c0_2] : memref<8x1xf32, #tpu.memory_space<vmem>>, vector<8x1xf32>
    %2 = vector.broadcast %1 : vector<8x1xf32> to vector<8x256xf32>
    %3 = arith.mulf %0, %2 : vector<8x256xf32>
    %c0_3 = arith.constant 0 : index
    %c0_4 = arith.constant 0 : index
    %4 = vector.load %arg3[%c0_3, %c0_4] : memref<8x256xf32, #tpu.memory_space<vmem>>, vector<8x256xf32>
    tpu.vector_store %arg3[%c0_3, %c0_4], %3 {strides = array<i32>} : memref<8x256xf32, #tpu.memory_space<vmem>>, vector<8x256xf32>,
    return
  }
  func.func @transform_0(%arg0: i32) -> (i32, i32) {
    %c0_i32 = arith.constant 0 : i32
    %c0_i32_0 = arith.constant 0 : i32
    return %arg0, %c0_i32 : i32, i32
  }
  func.func @transform_1(%arg0: i32) -> (i32, i32) {
    %c0_i32 = arith.constant 0 : i32
    %c0_i32_0 = arith.constant 0 : i32
    return %arg0, %c0_i32 : i32, i32
  }
  func.func @transform_2(%arg0: i32) -> (i32, i32) {
    %c0_i32 = arith.constant 0 : i32
    %c0_i32_0 = arith.constant 0 : i32
    return %arg0, %c0_i32 : i32, i32
  }
}

</mosaic_0001>

<bundles_post_ra>
// kernel: tpu_custom_call.1
= control target key start
LH: loop header
LB: loop body
LE: loop exit
PB: predicated region body
PF: predicated region fallthrough
CT: control target
= control target key end

     0   :  { %7 = vsyncpa [#allocation3], 0  ;;  %s148_s0 = inlined_call_operand.vmem [shape: f32[8,1], index: 0, kind: input, shape index: {}]   ;;  %s149_s1 = inlined_call_operand.hbm [shape: f32[8,256], index: 1, kind: input, shape index: {}]   ;;  %s150_s2 = inlined_call_operand.hbm [shape: f32[8,256], index: 2, kind: output, shape index: {}]  }
   0x1   :  { %8 = vsyncpa [#allocation4], 0  ;;  %s103_s9 = smov [#allocation2]   ;;  %s55_s13 = scalar_lea.hbm %s149_s1, 256 }
   0x2   :  { %s17_s10 = sshll.u32 %s103_s9, 4  ;;  %p56_p0 = scmp.ne.s32.totalorder %s149_s1, %s55_s13  ;;  %s18_s10 = int_to_ptr.vmem [resolvable:$true] %s17_s10 }
   0x3   :  { %p59_p1 = scmp.lt.u32.totalorder %s55_s13, %s149_s1 }
   0x5   :  { %p61_p2 = pnand %p59_p1, %p56_p0 }
   0x7   :  { %64 = shalt.err (!%p61_p2)
}
   0x8   :  { %s65_s18 = scalar_lea.vmem %s18_s10, 256  ;;  %p70_p4 = scmp.lt.s32.totalorder %s18_s10, %s18_s10 }
   0x9   :  { %p66_p3 = scmp.ne.s32.totalorder %s18_s10, %s65_s18  ;;  %p71_p5 = scmp.lt.s32.totalorder %s65_s18, %s65_s18 }
   0xb   :  { %p72_p6 = por %p71_p5, %p70_p4 }
   0xd   :  { %p73_p7 = pnand %p72_p6, %p66_p3 }
   0xf   :  { %76 = shalt.err (!%p73_p7)
}
  0x10   :  { %20 = dma.hbm_to_vmem [thread:$0]  %s149_s1, 256, %s18_s10, [#allocation3]  }
  0x11   :  { %99 = dma.done.wait [#allocation3], 256  }
  0x12   :  { %100 = vsyncadd [#allocation3], 4294967040  ;;  %v104_v0 = vmov 0   ;;  %v26_v1 = vld [vmem:[%s148_s0] sm:$0xff]  ;;  %v25_v3 = vld [vmem:[#allocation2 + $0x8] sm:$0xff]  ;;  %s105_s23 = smov [#allocation5]  }
  0x13   :  { %54 = vset.pattern.permute.xlu0 %v104_v0  ;;  %v24_v2 = vld [vmem:[#allocation2] sm:$0xff]  ;;  %s42_s24 = sshll.u32 %s105_s23, 4  ;;  %s43_s24 = int_to_ptr.vmem [resolvable:$true] %s42_s24 }
  0x14   :  { %29 = vperm.xlu0 %54, %v26_v1   ;;  %s77_s1 = scalar_lea.vmem %s43_s24, 256  ;;  %p82_p9 = scmp.lt.s32.totalorder %s43_s24, %s43_s24 }
  0x15   :  { %p78_p8 = scmp.ne.s32.totalorder %s43_s24, %s77_s1  ;;  %p83_p10 = scmp.lt.s32.totalorder %s77_s1, %s77_s1 }
  0x17   :  { %p84_p11 = por %p83_p10, %p82_p9 }
  0x19   :  { %p85_p12 = pnand %p84_p11, %p78_p8 }
  0x93   :  { %v30_v4 = vpop.permute.xlu0 %29 }
  0x94   :  { %v32_v5 = vmul.f32 %v30_v4, %v24_v2  ;;  %v33_v6 = vmul.f32 %v30_v4, %v25_v3 }
  0x96   :  { %34 = vst [vmem:[#allocation5] sm:$0xff] %v32_v5  ;;  %35 = vst [vmem:[#allocation5 + $0x8] sm:$0xff] %v33_v6 }
  0x97   :  { %88 = shalt.err (!%p85_p12)
}
  0x98   :  { %s89_s26 = scalar_lea.hbm %s150_s2, 256 }
  0x99   :  { %p90_p13 = scmp.ne.s32.totalorder %s150_s2, %s89_s26  ;;  %p93_p0 = scmp.lt.u32.totalorder %s89_s26, %s150_s2 }
  0x9b   :  { %p95_p1 = pnand %p93_p0, %p90_p13 }
  0x9d   :  { %98 = shalt.err (!%p95_p1)
}
  0x9e   :  { %45 = dma.vmem_to_hbm [thread:$0]  %s43_s24, 256, %s150_s2, [#allocation4]  }
  0x9f   :  { %101 = dma.done.wait [#allocation4], 256  }
  0xa0   :  { %102 = vsyncadd [#allocation4], 4294967040 }
  0xa1   :  { %49 = vsyncpa [#allocation3], 1 }
  0xa2   :  { %50 = vsyncpa [#allocation4], 1 }

</bundles_post_ra>
